<compile_context>
chip_gen: v5e
topology: v5e:2x2
jax: 0.10.0
libtpu: 0.0.40
codegen_flags: <defaults>
</compile_context>

<pallas_src>
import functools

import jax
import jax.numpy as jnp
from jax.experimental import pallas as pl
from jax.experimental.pallas import tpu as pltpu

H1 = 128
H2 = 64


def _round_up(n, m):
    return ((n + m - 1) // m) * m


def mlp_kernel(x_ref, w1_ref, b1_ref, w2_ref, b2_ref, w3_ref, b3_ref, o_ref):
    # Three MXU matmuls with f32 accumulation + f32 VPU bias/ReLU, fused on one
    # batch tile. Weights/biases are small resident full blocks.
    x = x_ref[...]
    h1 = jnp.dot(x, w1_ref[...], preferred_element_type=jnp.float32)
    h1 = jnp.maximum(h1 + b1_ref[...], 0.0)
    h2 = jnp.dot(h1, w2_ref[...], preferred_element_type=jnp.float32)
    h2 = jnp.maximum(h2 + b2_ref[...], 0.0)
    out = jnp.dot(h2, w3_ref[...], preferred_element_type=jnp.float32)
    o_ref[...] = (out + b3_ref[...]).astype(o_ref.dtype)


def _cap_tm_for_vmem(tm, d_in, d_out, vmem_budget=20 * 1024 * 1024):
    """Cap the batch tile so double-buffered x/out tiles + f32 intermediates
    + resident weights fit comfortably under the scoped VMEM limit."""
    per_row = 4 * (2 * d_in + 2 * d_out + 2 * H1 + H2)   # bytes per batch row
    weights = 4 * (d_in * H1 + H1 * H2 + H2 * d_out + H1 + H2 + d_out)
    avail = max(vmem_budget - weights, per_row * 8)
    cap = max(8, (avail // per_row) // 8 * 8)
    return min(tm, cap)


@functools.partial(jax.jit, static_argnames=("tm",))
def mlp_forward(x, params, *, tm=1024):
    """x: (B, input_dim) float32. params: dict of w1,b1,w2,b2,w3,b3 (f32)."""
    w1, b1 = params["w1"], params["b1"]
    w2, b2 = params["w2"], params["b2"]
    w3, b3 = params["w3"], params["b3"]

    B, d_in = x.shape
    h1 = w1.shape[1]            # 128
    h2 = w2.shape[1]            # 64
    d_out = w3.shape[1]

    # ---- batch tiling: big tiles, VMEM-guarded, megacore-friendly ----
    tm_eff = min(tm, _round_up(B, 8))
    tm_eff = _cap_tm_for_vmem(tm_eff, d_in, d_out)
    if B > 256:
        # Guarantee >=2 grid steps so the "parallel" axis can shard across
        # both v7x TensorCores (one extra step is ~free on 1-TC chips).
        half = _round_up((B + 1) // 2, 8)
        tm_eff = min(tm_eff, half)
    B_pad = _round_up(B, tm_eff)
    x_p = jnp.pad(x, ((0, B_pad - B), (0, 0))) if B_pad != B else x

    grid = (B_pad // tm_eff,)
    full = lambda shape: pl.BlockSpec(shape, lambda i: (0, 0))

    cost = pl.CostEstimate(
        flops=2 * B_pad * (d_in * h1 + h1 * h2 + h2 * d_out),
        transcendentals=0,
        bytes_accessed=4 * (B_pad * (d_in + d_out)
                            + d_in * h1 + h1 * h2 + h2 * d_out
                            + h1 + h2 + d_out),
    )

    out = pl.pallas_call(
        mlp_kernel,
        out_shape=jax.ShapeDtypeStruct((B_pad, d_out), x.dtype),
        grid_spec=pltpu.PrefetchScalarGridSpec(
            num_scalar_prefetch=0,
            grid=grid,
            in_specs=[
                pl.BlockSpec((tm_eff, d_in), lambda i: (i, 0)),   # x tile
                full((d_in, h1)), full((1, h1)),                  # w1, b1
                full((h1, h2)), full((1, h2)),                    # w2, b2
                full((h2, d_out)), full((1, d_out)),              # w3, b3
            ],
            out_specs=pl.BlockSpec((tm_eff, d_out), lambda i: (i, 0)),
        ),
        compiler_params=pltpu.CompilerParams(
            dimension_semantics=("parallel",),
            vmem_limit_bytes=32 * 1024 * 1024),
        cost_estimate=cost,
    )(x_p, w1, b1, w2, b2, w3, b3)

    # Strip batch padding only (output lanes are already narrow/d_out-wide).
    return out[:B, :]


def init_mlp_params(key, input_dim, output_dim):
    """Deterministic init mimicking PyTorch nn.Linear (U[-1/sqrt(fan_in), +])."""
    dims = [(input_dim, H1), (H1, H2), (H2, output_dim)]
    params = {}
    keys = jax.random.split(key, 2 * len(dims))
    for idx, (fan_in, fan_out) in enumerate(dims):
        bound = 1.0 / jnp.sqrt(float(fan_in))
        w = jax.random.uniform(keys[2 * idx], (fan_in, fan_out),
                               minval=-bound, maxval=bound, dtype=jnp.float32)
        b = jax.random.uniform(keys[2 * idx + 1], (1, fan_out),
                               minval=-bound, maxval=bound, dtype=jnp.float32)
        params[f"w{idx + 1}"] = w
        params[f"b{idx + 1}"] = b
    return params


def mlp_reference(x, params):
    """Pure-JAX f32 reference matching PyTorch nn.Linear forward semantics."""
    hp = jax.lax.Precision.HIGHEST
    h1 = jnp.maximum(
        jnp.dot(x, params["w1"], precision=hp) + params["b1"], 0.0)
    h2 = jnp.maximum(
        jnp.dot(h1, params["w2"], precision=hp) + params["b2"], 0.0)
    return jnp.dot(h2, params["w3"], precision=hp) + params["b3"]


if __name__ == "__main__":
    key = jax.random.PRNGKey(0)
    k_x, k_p = jax.random.split(key)

    batch, input_dim, output_dim = 16, 32, 8
    x = jax.random.normal(k_x, (batch, input_dim), dtype=jnp.float32)
    params = init_mlp_params(k_p, input_dim, output_dim)

    out = mlp_forward(x, params)
    out = jax.block_until_ready(out)

    ref = mlp_reference(x, params)
    assert out.shape == (batch, output_dim)
    assert jnp.allclose(out, ref, atol=1e-3, rtol=1e-3)

    print("KERNEL_OK")
</pallas_src>

<mosaic_0001>
module attributes {stable_mosaic.version = 11 : i64} {
  func.func @mlp_kernel(%arg0: i32, %arg1: memref<16x32xf32, #tpu.memory_space<vmem>>, %arg2: memref<32x128xf32, #tpu.memory_space<vmem>>, %arg3: memref<1x128xf32, #tpu.memory_space<vmem>>, %arg4: memref<128x64xf32, #tpu.memory_space<vmem>>, %arg5: memref<1x64xf32, #tpu.memory_space<vmem>>, %arg6: memref<64x8xf32, #tpu.memory_space<vmem>>, %arg7: memref<1x8xf32, #tpu.memory_space<vmem>>, %arg8: memref<16x8xf32, #tpu.memory_space<vmem>>) attributes {dimension_semantics = [#tpu.dimension_semantics<parallel>], iteration_bounds = array<i64: 1>, scalar_prefetch = 0 : i64, scratch_operands = 0 : i64, tpu.core_type = #tpu.core_type<tc>, window_params = [{transform_indices = @transform_0, window_bounds = array<i64: 16, 32>}, {pipeline_mode = #tpu.pipeline_mode<synchronous>, transform_indices = @transform_1, window_bounds = array<i64: 32, 128>}, {pipeline_mode = #tpu.pipeline_mode<synchronous>, transform_indices = @transform_2, window_bounds = array<i64: 1, 128>}, {pipeline_mode = #tpu.pipeline_mode<synchronous>, transform_indices = @transform_3, window_bounds = array<i64: 128, 64>}, {pipeline_mode = #tpu.pipeline_mode<synchronous>, transform_indices = @transform_4, window_bounds = array<i64: 1, 64>}, {pipeline_mode = #tpu.pipeline_mode<synchronous>, transform_indices = @transform_5, window_bounds = array<i64: 64, 8>}, {pipeline_mode = #tpu.pipeline_mode<synchronous>, transform_indices = @transform_6, window_bounds = array<i64: 1, 8>}, {transform_indices = @transform_7, window_bounds = array<i64: 16, 8>}]} {
    %c0 = arith.constant 0 : index
    %c0_0 = arith.constant 0 : index
    %0 = vector.load %arg1[%c0, %c0_0] : memref<16x32xf32, #tpu.memory_space<vmem>>, vector<16x32xf32>
    %c0_1 = arith.constant 0 : index
    %c0_2 = arith.constant 0 : index
    %1 = vector.load %arg2[%c0_1, %c0_2] : memref<32x128xf32, #tpu.memory_space<vmem>>, vector<32x128xf32>
    %cst = arith.constant dense<0.000000e+00> : vector<16x128xf32>
    %2 = tpu.matmul %0, %1, %cst {dimension_numbers = #tpu.dot_dimension_numbers<[1], [0], [0], [1], [0, 0, 1, 1], [], []>} : vector<16x32xf32>, vector<32x128xf32>, vector<16x128xf32> -> vector<16x128xf32>
    %c0_3 = arith.constant 0 : index
    %c0_4 = arith.constant 0 : index
    %3 = vector.load %arg3[%c0_3, %c0_4] : memref<1x128xf32, #tpu.memory_space<vmem>>, vector<1x128xf32>
    %4 = vector.broadcast %3 : vector<1x128xf32> to vector<16x128xf32>
    %5 = arith.addf %2, %4 : vector<16x128xf32>
    %cst_5 = arith.constant 0.000000e+00 : f32
    %6 = vector.broadcast %cst_5 : f32 to vector<16x128xf32>
    %7 = arith.maximumf %5, %6 : vector<16x128xf32>
    %c0_6 = arith.constant 0 : index
    %c0_7 = arith.constant 0 : index
    %8 = vector.load %arg4[%c0_6, %c0_7] : memref<128x64xf32, #tpu.memory_space<vmem>>, vector<128x64xf32>
    %cst_8 = arith.constant dense<0.000000e+00> : vector<16x64xf32>
    %9 = tpu.matmul %7, %8, %cst_8 {dimension_numbers = #tpu.dot_dimension_numbers<[1], [0], [0], [1], [0, 0, 1, 1], [], []>} : vector<16x128xf32>, vector<128x64xf32>, vector<16x64xf32> -> vector<16x64xf32>
    %c0_9 = arith.constant 0 : index
    %c0_10 = arith.constant 0 : index
    %10 = vector.load %arg5[%c0_9, %c0_10] : memref<1x64xf32, #tpu.memory_space<vmem>>, vector<1x64xf32>
    %11 = vector.broadcast %10 : vector<1x64xf32> to vector<16x64xf32>
    %12 = arith.addf %9, %11 : vector<16x64xf32>
    %cst_11 = arith.constant 0.000000e+00 : f32
    %13 = vector.broadcast %cst_11 : f32 to vector<16x64xf32>
    %14 = arith.maximumf %12, %13 : vector<16x64xf32>
    %c0_12 = arith.constant 0 : index
    %c0_13 = arith.constant 0 : index
    %15 = vector.load %arg6[%c0_12, %c0_13] : memref<64x8xf32, #tpu.memory_space<vmem>>, vector<64x8xf32>
    %cst_14 = arith.constant dense<0.000000e+00> : vector<16x8xf32>
    %16 = tpu.matmul %14, %15, %cst_14 {dimension_numbers = #tpu.dot_dimension_numbers<[1], [0], [0], [1], [0, 0, 1, 1], [], []>} : vector<16x64xf32>, vector<64x8xf32>, vector<16x8xf32> -> vector<16x8xf32>
    %c0_15 = arith.constant 0 : index
    %c0_16 = arith.constant 0 : index
    %17 = vector.load %arg7[%c0_15, %c0_16] : memref<1x8xf32, #tpu.memory_space<vmem>>, vector<1x8xf32>
    %18 = vector.broadcast %17 : vector<1x8xf32> to vector<16x8xf32>
    %19 = arith.addf %16, %18 : vector<16x8xf32>
    %c0_17 = arith.constant 0 : index
    %c0_18 = arith.constant 0 : index
    %20 = vector.load %arg8[%c0_17, %c0_18] : memref<16x8xf32, #tpu.memory_space<vmem>>, vector<16x8xf32>
    tpu.vector_store %arg8[%c0_17, %c0_18], %19 {strides = array<i32>} : memref<16x8xf32, #tpu.memory_space<vmem>>, vector<16x8xf32>,
    return
  }
  func.func @transform_0(%arg0: i32) -> (i32, i32) {
    %c0_i32 = arith.constant 0 : i32
    %c0_i32_0 = arith.constant 0 : i32
    return %arg0, %c0_i32 : i32, i32
  }
  func.func @transform_1(%arg0: i32) -> (i32, i32) {
    %c0_i32 = arith.constant 0 : i32
    %c0_i32_0 = arith.constant 0 : i32
    %c0_i32_1 = arith.constant 0 : i32
    return %c0_i32, %c0_i32_0 : i32, i32
  }
  func.func @transform_2(%arg0: i32) -> (i32, i32) {
    %c0_i32 = arith.constant 0 : i32
    %c0_i32_0 = arith.constant 0 : i32
    %c0_i32_1 = arith.constant 0 : i32
    return %c0_i32, %c0_i32_0 : i32, i32
  }
  func.func @transform_3(%arg0: i32) -> (i32, i32) {
    %c0_i32 = arith.constant 0 : i32
    %c0_i32_0 = arith.constant 0 : i32
    %c0_i32_1 = arith.constant 0 : i32
    return %c0_i32, %c0_i32_0 : i32, i32
  }
  func.func @transform_4(%arg0: i32) -> (i32, i32) {
    %c0_i32 = arith.constant 0 : i32
    %c0_i32_0 = arith.constant 0 : i32
    %c0_i32_1 = arith.constant 0 : i32
    return %c0_i32, %c0_i32_0 : i32, i32
  }
  func.func @transform_5(%arg0: i32) -> (i32, i32) {
    %c0_i32 = arith.constant 0 : i32
    %c0_i32_0 = arith.constant 0 : i32
    %c0_i32_1 = arith.constant 0 : i32
    return %c0_i32, %c0_i32_0 : i32, i32
  }
  func.func @transform_6(%arg0: i32) -> (i32, i32) {
    %c0_i32 = arith.constant 0 : i32
    %c0_i32_0 = arith.constant 0 : i32
    %c0_i32_1 = arith.constant 0 : i32
    return %c0_i32, %c0_i32_0 : i32, i32
  }
  func.func @transform_7(%arg0: i32) -> (i32, i32) {
    %c0_i32 = arith.constant 0 : i32
    %c0_i32_0 = arith.constant 0 : i32
    return %arg0, %c0_i32 : i32, i32
  }
}

</mosaic_0001>

<bundles_post_ra>
// kernel: mlp_forward.1
= control target key start
LH: loop header
LB: loop body
LE: loop exit
PB: predicated region body
PF: predicated region fallthrough
CT: control target
= control target key end

     0   :  { %vm36_vm0 = vcmask 261120   ;;  %vm125_vm1 = vcmask 523264   ;;  %vm155_vm2 = vcmask 64512   ;;  %s332_s1 = inlined_call_operand.vmem [shape: f32[32,128], index: 1, kind: input, shape index: {}]   ;;  %s333_s3 = inlined_call_operand.vmem [shape: f32[128,64], index: 3, kind: input, shape index: {}]   ;;  %s334_s0 = inlined_call_operand.vmem [shape: f32[16,32], index: 0, kind: input, shape index: {}]   ;;  %s335_s2 = inlined_call_operand.vmem [shape: f32[1,128], index: 2, kind: input, shape index: {}]   ;;  %s336_s4 = inlined_call_operand.vmem [shape: f32[1,64], index: 4, kind: input, shape index: {}]   ;;  %s337_s5 = inlined_call_operand.vmem [shape: f32[64,8], index: 5, kind: input, shape index: {}]   ;;  %s338_s6 = inlined_call_operand.vmem [shape: f32[1,8], index: 6, kind: input, shape index: {}]   ;;  %s339_s7 = inlined_call_operand.vmem [shape: f32[16,8], index: 7, kind: output, shape index: {}]  }
   0x1   :  { %v31_v0 = vld [vmem:[%s332_s1 + $0x18] sm:$0xff]  ;;  %v30_v1 = vld [vmem:[%s332_s1 + $0x10] sm:$0xff]  ;;  %v29_v2 = vld [vmem:[%s332_s1 + $0x8] sm:$0xff] }
   0x2   :  { %55 = vmatpush.msra.mxu0 %v31_v0  ;;  %v83_v3 = vld [vmem:[%s333_s3 + $0x78] sm:$0xff]  ;;  %v82_v4 = vld [vmem:[%s333_s3 + $0x70] sm:$0xff]  ;;  %v28_v5 = vld [vmem:[%s332_s1] sm:$0xff] }
   0x3   :  { %88 = vmatpush.msra.mxu1 %v83_v3  ;;  %v81_v6 = vld [vmem:[%s333_s3 + $0x68] sm:$0xff]  ;;  %166 = vmatpush.msra.mxu3 %v83_v3  ;;  %v26_v7 = vld [vmem:[%s334_s0] sm:$0xff]  ;;  %v79_v9 = vld [vmem:[%s333_s3 + $0x58] sm:$0xff] }
   0x4   :  { %56 = vmatpush.msra.mxu0 %v30_v1  ;;  %v80_v8 = vld [vmem:[%s333_s3 + $0x60] sm:$0xff]  ;;  %v78_v10 = vld [vmem:[%s333_s3 + $0x50] sm:$0xff]  ;;  %v77_v11 = vld [vmem:[%s333_s3 + $0x48] sm:$0xff] }
   0x5   :  { %89 = vmatpush.msra.mxu1 %v82_v4  ;;  %167 = vmatpush.msra.mxu3 %v82_v4  ;;  %v27_v12 = vld [vmem:[%s334_s0 + $0x8] sm:$0xff]  ;;  %v76_v13 = vld [vmem:[%s333_s3 + $0x40] sm:$0xff]  ;;  %v75_v14 = vld [vmem:[%s333_s3 + $0x38] sm:$0xff] }
   0x6   :  { %57 = vmatpush.msra.mxu0 %v29_v2  ;;  %v74_v15 = vld [vmem:[%s333_s3 + $0x30] sm:$0xff]  ;;  %v73_v16 = vld [vmem:[%s333_s3 + $0x28] sm:$0xff]  ;;  %v72_v17 = vld [vmem:[%s333_s3 + $0x20] sm:$0xff] }
   0x7   :  { %90 = vmatpush.msra.mxu1 %v81_v6  ;;  %168 = vmatpush.msra.mxu3 %v81_v6  ;;  %v71_v18 = vld [vmem:[%s333_s3 + $0x18] sm:$0xff]  ;;  %v70_v19 = vld [vmem:[%s333_s3 + $0x10] sm:$0xff]  ;;  %v69_v20 = vld [vmem:[%s333_s3 + $0x8] sm:$0xff] }
   0x8   :  { %58 = vmatpush.msra.mxu0 %v28_v5  ;;  %v68_v21 = vld [vmem:[%s333_s3] sm:$0xff]  ;;  %v120_v22 = vld [vmem:[%s337_s5 + $0x38] sm:$0xff]  ;;  %v119_v23 = vld [vmem:[%s337_s5 + $0x30] sm:$0xff] }
   0x9   :  { %162 = vmatmul.msk.f32.vlgmr.msra.gmra.mxu0 %vm36_vm0, %v26_v7  ;;  %91 = vmatpush.msra.mxu1 %v80_v8  ;;  %v118_v24 = vld [vmem:[%s337_s5 + $0x28] sm:$0xff]  ;;  %v117_v25 = vld [vmem:[%s337_s5 + $0x20] sm:$0xff]  ;;  %v116_v26 = vld [vmem:[%s337_s5 + $0x18] sm:$0xff] }
   0xa   :  { %169 = vmatpush.msra.mxu3 %v80_v8  ;;  %140 = vmatpush.msra.mxu2 %v120_v22  ;;  %v182_v27 = vld [vmem:[%s335_s2] ss:$0 sm:$0xff]  ;;  %v115_v34 = vld [vmem:[%s337_s5 + $0x10] sm:$0xff]  ;;  %v114_v35 = vld [vmem:[%s337_s5 + $0x8] sm:$0xff] }
   0xb   :  { %92 = vmatpush.msra.mxu1 %v79_v9  ;;  %v113_v36 = vld [vmem:[%s337_s5] sm:$0xff] }
   0xc   :  { %170 = vmatpush.msra.mxu3 %v79_v9  ;;  %141 = vmatpush.msra.mxu2 %v119_v23  ;;  %v183_v37 = vld [vmem:[%s336_s4] ss:$0 sm:$0xff] }
   0xd   :  { %93 = vmatpush.msra.mxu1 %v78_v10  ;;  %v184_v44 = vld [vmem:[%s338_s6] ss:$0 sm:$0xff] }
   0xe   :  { %171 = vmatpush.msra.mxu3 %v78_v10  ;;  %142 = vmatpush.msra.mxu2 %v118_v24 }
   0xf   :  { %94 = vmatpush.msra.mxu1 %v77_v11 }
  0x10   :  { %172 = vmatpush.msra.mxu3 %v77_v11  ;;  %143 = vmatpush.msra.mxu2 %v117_v25 }
  0x11   :  { %163 = vmatmul.msk.f32.gmra.mxu0 %vm36_vm0, %v27_v12  ;;  %95 = vmatpush.msra.mxu1 %v76_v13 }
  0x12   :  { %173 = vmatpush.msra.mxu3 %v76_v13  ;;  %144 = vmatpush.msra.mxu2 %v116_v26 }
  0x13   :  { %96 = vmatpush.msra.mxu1 %v75_v14 }
  0x14   :  { %174 = vmatpush.msra.mxu3 %v75_v14  ;;  %145 = vmatpush.msra.mxu2 %v115_v34 }
  0x15   :  { %97 = vmatpush.msra.mxu1 %v74_v15 }
  0x16   :  { %175 = vmatpush.msra.mxu3 %v74_v15  ;;  %146 = vmatpush.msra.mxu2 %v114_v35 }
  0x17   :  { %98 = vmatpush.msra.mxu1 %v73_v16 }
  0x18   :  { %176 = vmatpush.msra.mxu3 %v73_v16  ;;  %147 = vmatpush.msra.mxu2 %v113_v36 }
  0x19   :  { %99 = vmatpush.msra.mxu1 %v72_v17 }
  0x1a   :  { %177 = vmatpush.msra.mxu3 %v72_v17 }
  0x1b   :  { %100 = vmatpush.msra.mxu1 %v71_v18 }
  0x1c   :  { %178 = vmatpush.msra.mxu3 %v71_v18 }
  0x1d   :  { %101 = vmatpush.msra.mxu1 %v70_v19 }
  0x1e   :  { %179 = vmatpush.msra.mxu3 %v70_v19 }
  0x1f   :  { %102 = vmatpush.msra.mxu1 %v69_v20 }
  0x20   :  { %180 = vmatpush.msra.mxu3 %v69_v20 }
  0x21   :  { %103 = vmatpush.msra.mxu1 %v68_v21 }
  0x22   :  { %181 = vmatpush.msra.mxu3 %v68_v21 }
  0x86   :  { %v60_v28 = vpop.f32.mrf.mxu0 }
  0x87   :  { %v61_v29 = vadd.f32 %v182_v27, %v60_v28 }
  0x89   :  { %v66_v30 = vmax.f32 %v61_v29, 0.0 }
  0x8b   :  { %104 = vmatmul.f32.vlgmr.msra.gmra.mxu1 %v66_v30 }
  0x8e   :  { %v63_v31 = vpop.f32.mrf.mxu0 }
  0x8f   :  { %v64_v32 = vadd.f32 %v182_v27, %v63_v31 }
  0x91   :  { %v67_v33 = vmax.f32 %v64_v32, 0.0 }
  0x93   :  { %107 = vmatmul.f32.vlgmr.msra.gmra.mxu3 %v67_v33 }
 0x108   :  { %v105_v38 = vpop.f32.mrf.mxu1 }
 0x109   :  { %v106_v39 = vadd.f32 %v183_v37, %v105_v38 }
 0x10b   :  { %v111_v40 = vmax.f32 %v106_v39, 0.0 }
 0x10d   :  { %164 = vmatmul.msk.f32.vlgmr.msra.gmra.mxu2 %vm125_vm1, %v111_v40 }
 0x116   :  { %v108_v41 = vpop.f32.mrf.mxu3 }
 0x117   :  { %v109_v42 = vadd.f32 %v183_v37, %v108_v41 }
 0x119   :  { %v112_v43 = vmax.f32 %v109_v42, 0.0 }
 0x11b   :  { %165 = vmatmul.msk.f32.gmra.mxu2 %vm125_vm1, %v112_v43 }
 0x190   :  { %v149_v45 = vpop.f32.mrf.mxu2 }
 0x191   :  { %v150_v46 = vadd.f32 %v184_v44, %v149_v45 }
 0x193   :  { %156 = vst.msk [vmem:[%s339_s7] sm:$0xff] %vm155_vm2, %v150_v46 }
 0x19e   :  { %v152_v47 = vpop.f32.mrf.mxu2 }
 0x19f   :  { %v153_v48 = vadd.f32 %v184_v44, %v152_v47 }
 0x1a1   :  { %157 = vst.msk [vmem:[%s339_s7 + $0x8] sm:$0xff] %vm155_vm2, %v153_v48 }

</bundles_post_ra>
